<compile_context>
chip_gen: v7x
topology: tpu7x:2x2x1
jax: 0.10.0
libtpu: 0.0.40
codegen_flags: <defaults>
</compile_context>

<pallas_src>
import math
from functools import partial

import jax
import jax.numpy as jnp
from jax.experimental import pallas as pl
from jax.experimental.pallas import tpu as pltpu

_LN_EPS = 1e-5
_INV_SQRT2 = 1.0 / math.sqrt(2.0)
_MIN_ROW_TILE = 16
_MIB = 1024 * 1024


def _cdiv(a, b):
    return -(-a // b)


def _round_up(x, m):
    return _cdiv(x, m) * m


# ----------------------------------------------------------------------------
# Kernels
# ----------------------------------------------------------------------------
def _ff_kernel_single(x_ref, w1_ref, b1_ref, w2_ref, b2_ref, o_ref):
    """Whole hidden dim resident: LN -> Linear -> GELU -> Linear in one pass."""
    x = x_ref[...].astype(jnp.float32)
    mu = jnp.mean(x, axis=-1, keepdims=True)
    xc = x - mu
    var = jnp.mean(xc * xc, axis=-1, keepdims=True)          # two-pass variance
    xn = xc * jax.lax.rsqrt(var + _LN_EPS)
    # Linear(dim -> hidden): bf16 operands, f32 accumulation on the MXU.
    h = jnp.dot(xn.astype(jnp.bfloat16), w1_ref[...],
                preferred_element_type=jnp.float32)
    h = h + b1_ref[...]
    # Exact (erf) GELU, matching nn.GELU default.
    h = 0.5 * h * (1.0 + jax.lax.erf(h * _INV_SQRT2))
    out = jnp.dot(h.astype(jnp.bfloat16), w2_ref[...],
                  preferred_element_type=jnp.float32)
    o_ref[...] = (out + b2_ref[...]).astype(o_ref.dtype)


def _ff_kernel_tiled(x_ref, w1_ref, b1_ref, w2_ref, b2_ref, o_ref,
                     xn_ref, acc_ref):
    """Hidden axis tiled: grid = (row_tiles, hidden_tiles); the hidden axis is
    a reduction for the second matmul (f32 VMEM accumulator)."""
    j = pl.program_id(1)

    @pl.when(j == 0)
    def _ln():
        # LayerNorm once per row tile (gamma/beta folded into w1/b1 on host),
        # cached as bf16 for the MXU.
        x = x_ref[...].astype(jnp.float32)
        mu = jnp.mean(x, axis=-1, keepdims=True)
        xc = x - mu
        var = jnp.mean(xc * xc, axis=-1, keepdims=True)
        xn_ref[...] = (xc * jax.lax.rsqrt(var + _LN_EPS)).astype(xn_ref.dtype)

    h = jnp.dot(xn_ref[...], w1_ref[...], preferred_element_type=jnp.float32)
    h = h + b1_ref[...]
    h = 0.5 * h * (1.0 + jax.lax.erf(h * _INV_SQRT2))
    part = jnp.dot(h.astype(jnp.bfloat16), w2_ref[...],
                   preferred_element_type=jnp.float32)

    # No zero-init pass: the first hidden step writes directly.
    @pl.when(j == 0)
    def _first():
        acc_ref[...] = part

    @pl.when(j > 0)
    def _acc():
        acc_ref[...] += part

    @pl.when(j == pl.num_programs(1) - 1)
    def _finalize():
        o_ref[...] = (acc_ref[...] + b2_ref[...]).astype(o_ref.dtype)


# ----------------------------------------------------------------------------
# Generation-aware tile selection
# ----------------------------------------------------------------------------
def _gen_params():
    kind = ""
    try:
        kind = jax.devices()[0].device_kind.lower()
    except Exception:
        pass
    if "v7" in kind:      # 64 MiB VMEM per TC, 2 TCs/chip
        return dict(vmem_limit=48 * _MIB, row_tile=512, num_cores=2)
    if "v6" in kind:      # 128 MiB VMEM, bf16 ridge ~640 flop/byte
        return dict(vmem_limit=100 * _MIB, row_tile=1024, num_cores=1)
    if "v5e" in kind or "v5 lite" in kind or "v5lite" in kind:
        return dict(vmem_limit=100 * _MIB, row_tile=256, num_cores=1)
    # Unknown / other generations: conservative defaults.
    return dict(vmem_limit=64 * _MIB, row_tile=512, num_cores=1)


def _vmem_usage(row_tile, tn, dim, x_bytes, out_bytes, single_pass, wbuf):
    """Approximate resident VMEM (Pallas buffers + f32 hidden intermediate)."""
    row = row_tile * dim * (2 * x_bytes + 2 * out_bytes)      # x + out, double-buffered
    if not single_pass:
        row += row_tile * dim * (2 + 4)                       # bf16 xn cache + f32 acc
    weights = wbuf * 4 * dim * tn                             # w1 + w2 (bf16) * wbuf
    biases = wbuf * (tn + dim) * 4
    interm = 2 * row_tile * tn * 4                            # f32 hidden act + GELU temps
    return row + weights + biases + interm


def _row_tile_candidates(start):
    start = max(_MIN_ROW_TILE, _round_up(start, _MIN_ROW_TILE))
    cands, rt = [], start
    while rt >= _MIN_ROW_TILE:
        r = max(_MIN_ROW_TILE, _round_up(rt, _MIN_ROW_TILE))
        if r not in cands:
            cands.append(r)
        if rt == _MIN_ROW_TILE:
            break
        rt //= 2
    return cands


def _select_config(M, dim, hidden, x_bytes, out_bytes, allow_single_buffer=True):
    gen = _gen_params()
    budget = gen["vmem_limit"] - 2 * _MIB

    row_start = min(gen["row_tile"], max(_MIN_ROW_TILE, _round_up(M, _MIN_ROW_TILE)))
    if gen["num_cores"] > 1 and M > _MIN_ROW_TILE:
        # Ensure at least num_cores row tiles so every TensorCore gets work.
        per_core = max(_MIN_ROW_TILE, _round_up(_cdiv(M, gen["num_cores"]), _MIN_ROW_TILE))
        row_start = min(row_start, per_core)

    cands = _row_tile_candidates(row_start)

    # Phase 1: whole weights resident (tn == hidden) -> weights DMA'd once.
    sp_floor = min(256, cands[0])
    wbuf = 1 if allow_single_buffer else 2
    for rt in cands:
        if rt < sp_floor:
            break
        if _vmem_usage(rt, hidden, dim, x_bytes, out_bytes, True, wbuf) <= budget:
            return dict(row_tile=rt, tn=hidden, single_pass=True,
                        single_buffer=allow_single_buffer,
                        vmem_limit=gen["vmem_limit"])

    # Phase 2: tile the hidden axis.  Weights re-stream once per row tile, so
    # prefer the largest row tile, then the largest hidden tile that fits.
    tns = [t for t in range((hidden // 128) * 128, 0, -128) if hidden % t == 0]
    for rt in cands:
        for tn in tns:
            if _vmem_usage(rt, tn, dim, x_bytes, out_bytes, False, 2) <= budget:
                return dict(row_tile=rt, tn=tn, single_pass=False,
                            single_buffer=False, vmem_limit=gen["vmem_limit"])

    # Last resort: smallest tiles (estimate exceeded; let the compiler try).
    tn = tns[-1] if tns else hidden
    return dict(row_tile=cands[-1], tn=tn, single_pass=(tn == hidden),
                single_buffer=False, vmem_limit=gen["vmem_limit"])


# ----------------------------------------------------------------------------
# pallas_call wrapper
# ----------------------------------------------------------------------------
@partial(jax.jit, static_argnames=("row_tile", "tn", "single_pass",
                                   "single_buffer", "vmem_limit"))
def _ff_impl(x, gamma, beta, w1, b1, w2, b2, *,
             row_tile, tn, single_pass, single_buffer, vmem_limit):
    B, N, dim = x.shape
    hidden = w1.shape[1]
    assert row_tile % 16 == 0, "row_tile must be a multiple of 16"
    assert hidden % tn == 0
    assert tn == hidden or tn % 128 == 0
    if single_pass:
        assert tn == hidden

    # Fold LayerNorm affine into the first Linear:
    # (xn*g + beta) @ W1 + b1 == xn @ (g[:,None]*W1) + (beta@W1 + b1).
    w1f = w1.astype(jnp.float32)
    w1_folded = gamma.astype(jnp.float32)[:, None] * w1f
    b1_folded = beta.astype(jnp.float32) @ w1f + b1.astype(jnp.float32)

    w1_bf = w1_folded.astype(jnp.bfloat16)
    w2_bf = w2.astype(jnp.bfloat16)
    b1_2 = b1_folded.reshape(1, hidden)
    b2_2 = b2.astype(jnp.float32).reshape(1, dim)

    # Flatten tokens; zero-pad rows to a multiple of row_tile.
    M = B * N
    n_row = _cdiv(M, row_tile)
    M_pad = n_row * row_tile
    x2d = x.reshape(M, dim)
    if M_pad != M:
        x2d = jnp.pad(x2d, ((0, M_pad - M), (0, 0)))

    const_mode = pl.Buffered(1) if single_buffer else None

    if single_pass:
        grid = (n_row,)
        in_specs = [
            pl.BlockSpec((row_tile, dim), lambda i: (i, 0)),                           # x rows
            pl.BlockSpec((dim, tn), lambda i: (0, 0), pipeline_mode=const_mode),       # w1
            pl.BlockSpec((1, tn), lambda i: (0, 0), pipeline_mode=const_mode),         # b1
            pl.BlockSpec((tn, dim), lambda i: (0, 0), pipeline_mode=const_mode),       # w2
            pl.BlockSpec((1, dim), lambda i: (0, 0), pipeline_mode=const_mode),        # b2
        ]
        out_specs = pl.BlockSpec((row_tile, dim), lambda i: (i, 0))
        scratch = []
        kernel = _ff_kernel_single
        dims = ("parallel",)
    else:
        grid = (n_row, hidden // tn)
        in_specs = [
            pl.BlockSpec((row_tile, dim), lambda i, j: (i, 0)),   # x rows
            pl.BlockSpec((dim, tn), lambda i, j: (0, j)),         # w1 tile
            pl.BlockSpec((1, tn), lambda i, j: (0, j)),           # b1 tile
            pl.BlockSpec((tn, dim), lambda i, j: (j, 0)),         # w2 tile
            pl.BlockSpec((1, dim), lambda i, j: (0, 0)),          # b2
        ]
        out_specs = pl.BlockSpec((row_tile, dim), lambda i, j: (i, 0))
        scratch = [
            pltpu.VMEM((row_tile, dim), jnp.bfloat16),   # cached LayerNorm rows
            pltpu.VMEM((row_tile, dim), jnp.float32),    # 2nd-matmul accumulator
        ]
        kernel = _ff_kernel_tiled
        dims = ("parallel", "arbitrary")

    out2d = pl.pallas_call(
        kernel,
        out_shape=jax.ShapeDtypeStruct((M_pad, dim), x.dtype),
        grid_spec=pltpu.PrefetchScalarGridSpec(
            num_scalar_prefetch=0,
            grid=grid,
            in_specs=in_specs,
            out_specs=out_specs,
            scratch_shapes=scratch,
        ),
        compiler_params=pltpu.CompilerParams(
            dimension_semantics=dims,
            vmem_limit_bytes=vmem_limit,
        ),
    )(x2d, w1_bf, b1_2, w2_bf, b2_2)

    return out2d[:M].reshape(B, N, dim)


def feed_forward(x, gamma, beta, w1, b1, w2, b2, row_tile=None, hidden_tile=None):
    """x: (B, N, dim) -> (B, N, dim).  Linear weights stored as (in, out)."""
    B, N, dim = x.shape
    hidden = w1.shape[1]
    M = B * N
    nbytes = jnp.dtype(x.dtype).itemsize

    def _apply_overrides(cfg):
        cfg = dict(cfg)
        if row_tile is not None:
            assert row_tile % 16 == 0, "row_tile must be a multiple of 16"
            cfg["row_tile"] = row_tile
        if hidden_tile is not None:
            assert hidden % hidden_tile == 0
            assert hidden_tile == hidden or hidden_tile % 128 == 0
            cfg["tn"] = hidden_tile
            cfg["single_pass"] = hidden_tile == hidden
            if not cfg["single_pass"]:
                cfg["single_buffer"] = False
        return cfg

    cfg = _apply_overrides(_select_config(M, dim, hidden, nbytes, nbytes))
    try:
        return _ff_impl(x, gamma, beta, w1, b1, w2, b2, **cfg)
    except Exception:
        if not cfg["single_buffer"]:
            raise
        # Retry without pl.Buffered(1) single-buffering of constant operands,
        # in case this jax/libtpu build rejects buffer_count=1.
        cfg = _apply_overrides(
            _select_config(M, dim, hidden, nbytes, nbytes, allow_single_buffer=False))
        return _ff_impl(x, gamma, beta, w1, b1, w2, b2, **cfg)


# ----------------------------------------------------------------------------
# Self-test
# ----------------------------------------------------------------------------
def _reference(x, gamma, beta, w1, b1, w2, b2):
    xf = x.astype(jnp.float32)
    mu = xf.mean(-1, keepdims=True)
    var = ((xf - mu) ** 2).mean(-1, keepdims=True)
    xn = (xf - mu) / jnp.sqrt(var + _LN_EPS) * gamma + beta
    h = xn @ w1 + b1
    h = 0.5 * h * (1.0 + jax.lax.erf(h / math.sqrt(2.0)))
    return h @ w2 + b2


def _make_params(keys, dim, hidden):
    kg, kb, kw1, kb1, kw2, kb2 = keys
    gamma = 1.0 + 0.1 * jax.random.normal(kg, (dim,), jnp.float32)
    beta = 0.1 * jax.random.normal(kb, (dim,), jnp.float32)
    # (in, out) = transpose of PyTorch nn.Linear.weight
    w1 = jax.random.normal(kw1, (dim, hidden), jnp.float32) / math.sqrt(dim)
    b1 = 0.01 * jax.random.normal(kb1, (hidden,), jnp.float32)
    w2 = jax.random.normal(kw2, (hidden, dim), jnp.float32) / math.sqrt(hidden)
    b2 = 0.01 * jax.random.normal(kb2, (dim,), jnp.float32)
    return gamma, beta, w1, b1, w2, b2


if __name__ == "__main__":
    key = jax.random.PRNGKey(0)
    keys = jax.random.split(key, 14)

    # Test 1: tiny shapes (B=2, N=8, dim=32, hidden=64) -> single-pass kernel.
    B, N, DIM, HID = 2, 8, 32, 64
    x = jax.random.normal(keys[0], (B, N, DIM), dtype=jnp.float32)
    params = _make_params(keys[1:7], DIM, HID)
    out = jax.block_until_ready(feed_forward(x, *params))
    ref = _reference(x, *params)
    assert jnp.allclose(out, ref, atol=5e-2, rtol=5e-2), (
        f"single-pass mismatch, max_err={float(jnp.max(jnp.abs(out - ref)))}")

    # Test 2: force the hidden-tiled reduction path (hidden_tile < hidden).
    B2, N2, DIM2, HID2 = 2, 64, 128, 256
    x2 = jax.random.normal(keys[7], (B2, N2, DIM2), dtype=jnp.float32)
    params2 = _make_params(keys[8:14], DIM2, HID2)
    out2 = jax.block_until_ready(feed_forward(x2, *params2, hidden_tile=128))
    ref2 = _reference(x2, *params2)
    assert jnp.allclose(out2, ref2, atol=5e-2, rtol=5e-2), (
        f"tiled mismatch, max_err={float(jnp.max(jnp.abs(out2 - ref2)))}")

    print("KERNEL_OK")
</pallas_src>

<mosaic_0001>
module attributes {stable_mosaic.version = 11 : i64} {
  func.func @_ff_kernel_single(%arg0: i32, %arg1: memref<16x32xf32, #tpu.memory_space<vmem>>, %arg2: memref<32x64xbf16, #tpu.memory_space<vmem>>, %arg3: memref<1x64xf32, #tpu.memory_space<vmem>>, %arg4: memref<64x32xbf16, #tpu.memory_space<vmem>>, %arg5: memref<1x32xf32, #tpu.memory_space<vmem>>, %arg6: memref<16x32xf32, #tpu.memory_space<vmem>>) attributes {dimension_semantics = [#tpu.dimension_semantics<parallel>], iteration_bounds = array<i64: 1>, scalar_prefetch = 0 : i64, scratch_operands = 0 : i64, tpu.core_type = #tpu.core_type<tc>, window_params = [{transform_indices = @transform_0, window_bounds = array<i64: 16, 32>}, {pipeline_mode = #tpu.pipeline_mode<synchronous>, transform_indices = @transform_1, window_bounds = array<i64: 32, 64>}, {pipeline_mode = #tpu.pipeline_mode<synchronous>, transform_indices = @transform_2, window_bounds = array<i64: 1, 64>}, {pipeline_mode = #tpu.pipeline_mode<synchronous>, transform_indices = @transform_3, window_bounds = array<i64: 64, 32>}, {pipeline_mode = #tpu.pipeline_mode<synchronous>, transform_indices = @transform_4, window_bounds = array<i64: 1, 32>}, {transform_indices = @transform_5, window_bounds = array<i64: 16, 32>}]} {
    %c0 = arith.constant 0 : index
    %c0_0 = arith.constant 0 : index
    %0 = vector.load %arg1[%c0, %c0_0] : memref<16x32xf32, #tpu.memory_space<vmem>>, vector<16x32xf32>
    %cst = arith.constant dense<0.000000e+00> : vector<16xf32>
    %1 = vector.multi_reduction <add>, %0, %cst [1] : vector<16x32xf32> to vector<16xf32>
    %2 = vector.shape_cast %1 : vector<16xf32> to vector<16x1xf32>
    %cst_1 = arith.constant 3.200000e+01 : f32
    %3 = vector.broadcast %cst_1 : f32 to vector<16x1xf32>
    %4 = arith.divf %2, %3 : vector<16x1xf32>
    %5 = vector.broadcast %4 : vector<16x1xf32> to vector<16x32xf32>
    %6 = arith.subf %0, %5 : vector<16x32xf32>
    %7 = arith.mulf %6, %6 : vector<16x32xf32>
    %cst_2 = arith.constant dense<0.000000e+00> : vector<16xf32>
    %8 = vector.multi_reduction <add>, %7, %cst_2 [1] : vector<16x32xf32> to vector<16xf32>
    %9 = vector.shape_cast %8 : vector<16xf32> to vector<16x1xf32>
    %cst_3 = arith.constant 3.200000e+01 : f32
    %10 = vector.broadcast %cst_3 : f32 to vector<16x1xf32>
    %11 = arith.divf %9, %10 : vector<16x1xf32>
    %cst_4 = arith.constant 9.99999974E-6 : f32
    %12 = vector.broadcast %cst_4 : f32 to vector<16x1xf32>
    %13 = arith.addf %11, %12 : vector<16x1xf32>
    %14 = math.rsqrt %13 : vector<16x1xf32>
    %15 = vector.broadcast %14 : vector<16x1xf32> to vector<16x32xf32>
    %16 = arith.mulf %6, %15 : vector<16x32xf32>
    %17 = arith.truncf %16 : vector<16x32xf32> to vector<16x32xbf16>
    %c0_5 = arith.constant 0 : index
    %c0_6 = arith.constant 0 : index
    %18 = vector.load %arg2[%c0_5, %c0_6] : memref<32x64xbf16, #tpu.memory_space<vmem>>, vector<32x64xbf16>
    %cst_7 = arith.constant dense<0.000000e+00> : vector<16x64xf32>
    %19 = tpu.matmul %17, %18, %cst_7 {dimension_numbers = #tpu.dot_dimension_numbers<[1], [0], [0], [1], [0, 0, 1, 1], [], []>} : vector<16x32xbf16>, vector<32x64xbf16>, vector<16x64xf32> -> vector<16x64xf32>
    %c0_8 = arith.constant 0 : index
    %c0_9 = arith.constant 0 : index
    %20 = vector.load %arg3[%c0_8, %c0_9] : memref<1x64xf32, #tpu.memory_space<vmem>>, vector<1x64xf32>
    %21 = vector.broadcast %20 : vector<1x64xf32> to vector<16x64xf32>
    %22 = arith.addf %19, %21 : vector<16x64xf32>
    %cst_10 = arith.constant 5.000000e-01 : f32
    %23 = vector.broadcast %cst_10 : f32 to vector<16x64xf32>
    %24 = arith.mulf %23, %22 : vector<16x64xf32>
    %cst_11 = arith.constant 0.707106769 : f32
    %25 = vector.broadcast %cst_11 : f32 to vector<16x64xf32>
    %26 = arith.mulf %22, %25 : vector<16x64xf32>
    %27 = math.erf %26 : vector<16x64xf32>
    %cst_12 = arith.constant 1.000000e+00 : f32
    %28 = vector.broadcast %cst_12 : f32 to vector<16x64xf32>
    %29 = arith.addf %28, %27 : vector<16x64xf32>
    %30 = arith.mulf %24, %29 : vector<16x64xf32>
    %31 = arith.truncf %30 : vector<16x64xf32> to vector<16x64xbf16>
    %c0_13 = arith.constant 0 : index
    %c0_14 = arith.constant 0 : index
    %32 = vector.load %arg4[%c0_13, %c0_14] : memref<64x32xbf16, #tpu.memory_space<vmem>>, vector<64x32xbf16>
    %cst_15 = arith.constant dense<0.000000e+00> : vector<16x32xf32>
    %33 = tpu.matmul %31, %32, %cst_15 {dimension_numbers = #tpu.dot_dimension_numbers<[1], [0], [0], [1], [0, 0, 1, 1], [], []>} : vector<16x64xbf16>, vector<64x32xbf16>, vector<16x32xf32> -> vector<16x32xf32>
    %c0_16 = arith.constant 0 : index
    %c0_17 = arith.constant 0 : index
    %34 = vector.load %arg5[%c0_16, %c0_17] : memref<1x32xf32, #tpu.memory_space<vmem>>, vector<1x32xf32>
    %35 = vector.broadcast %34 : vector<1x32xf32> to vector<16x32xf32>
    %36 = arith.addf %33, %35 : vector<16x32xf32>
    %c0_18 = arith.constant 0 : index
    %c0_19 = arith.constant 0 : index
    %37 = vector.load %arg6[%c0_18, %c0_19] : memref<16x32xf32, #tpu.memory_space<vmem>>, vector<16x32xf32>
    tpu.vector_store %arg6[%c0_18, %c0_19], %36 {strides = array<i32>} : memref<16x32xf32, #tpu.memory_space<vmem>>, vector<16x32xf32>,
    return
  }
  func.func @transform_0(%arg0: i32) -> (i32, i32) {
    %c0_i32 = arith.constant 0 : i32
    %c0_i32_0 = arith.constant 0 : i32
    return %arg0, %c0_i32 : i32, i32
  }
  func.func @transform_1(%arg0: i32) -> (i32, i32) {
    %c0_i32 = arith.constant 0 : i32
    %c0_i32_0 = arith.constant 0 : i32
    %c0_i32_1 = arith.constant 0 : i32
    return %c0_i32, %c0_i32_0 : i32, i32
  }
  func.func @transform_2(%arg0: i32) -> (i32, i32) {
    %c0_i32 = arith.constant 0 : i32
    %c0_i32_0 = arith.constant 0 : i32
    %c0_i32_1 = arith.constant 0 : i32
    return %c0_i32, %c0_i32_0 : i32, i32
  }
  func.func @transform_3(%arg0: i32) -> (i32, i32) {
    %c0_i32 = arith.constant 0 : i32
    %c0_i32_0 = arith.constant 0 : i32
    %c0_i32_1 = arith.constant 0 : i32
    return %c0_i32, %c0_i32_0 : i32, i32
  }
  func.func @transform_4(%arg0: i32) -> (i32, i32) {
    %c0_i32 = arith.constant 0 : i32
    %c0_i32_0 = arith.constant 0 : i32
    %c0_i32_1 = arith.constant 0 : i32
    return %c0_i32, %c0_i32_0 : i32, i32
  }
  func.func @transform_5(%arg0: i32) -> (i32, i32) {
    %c0_i32 = arith.constant 0 : i32
    %c0_i32_0 = arith.constant 0 : i32
    return %arg0, %c0_i32 : i32, i32
  }
}

module attributes {stable_mosaic.version = 11 : i64} {
  func.func @_ff_kernel_single(%arg0: i32, %arg1: memref<16x32xf32, #tpu.memory_space<vmem>>, %arg2: memref<32x64xbf16, #tpu.memory_space<vmem>>, %arg3: memref<1x64xf32, #tpu.memory_space<vmem>>, %arg4: memref<64x32xbf16, #tpu.memory_space<vmem>>, %arg5: memref<1x32xf32, #tpu.memory_space<vmem>>, %arg6: memref<16x32xf32, #tpu.memory_space<vmem>>) attributes {dimension_semantics = [#tpu.dimension_semantics<parallel>], iteration_bounds = array<i64: 1>, scalar_prefetch = 0 : i64, scratch_operands = 0 : i64, tpu.core_type = #tpu.core_type<tc>, window_params = [{transform_indices = @transform_0, window_bounds = array<i64: 16, 32>}, {pipeline_mode = #tpu.pipeline_mode<synchronous>, transform_indices = @transform_1, window_bounds = array<i64: 32, 64>}, {pipeline_mode = #tpu.pipeline_mode<synchronous>, transform_indices = @transform_2, window_bounds = array<i64: 1, 64>}, {pipeline_mode = #tpu.pipeline_mode<synchronous>, transform_indices = @transform_3, window_bounds = array<i64: 64, 32>}, {pipeline_mode = #tpu.pipeline_mode<synchronous>, transform_indices = @transform_4, window_bounds = array<i64: 1, 32>}, {transform_indices = @transform_5, window_bounds = array<i64: 16, 32>}]} {
    %c0 = arith.constant 0 : index
    %c0_0 = arith.constant 0 : index
    %0 = vector.load %arg1[%c0, %c0_0] : memref<16x32xf32, #tpu.memory_space<vmem>>, vector<16x32xf32>
    %cst = arith.constant dense<0.000000e+00> : vector<16xf32>
    %1 = vector.multi_reduction <add>, %0, %cst [1] : vector<16x32xf32> to vector<16xf32>
    %2 = vector.shape_cast %1 : vector<16xf32> to vector<16x1xf32>
    %cst_1 = arith.constant 3.200000e+01 : f32
    %3 = vector.broadcast %cst_1 : f32 to vector<16x1xf32>
    %4 = arith.divf %2, %3 : vector<16x1xf32>
    %5 = vector.broadcast %4 : vector<16x1xf32> to vector<16x32xf32>
    %6 = arith.subf %0, %5 : vector<16x32xf32>
    %7 = arith.mulf %6, %6 : vector<16x32xf32>
    %cst_2 = arith.constant dense<0.000000e+00> : vector<16xf32>
    %8 = vector.multi_reduction <add>, %7, %cst_2 [1] : vector<16x32xf32> to vector<16xf32>
    %9 = vector.shape_cast %8 : vector<16xf32> to vector<16x1xf32>
    %cst_3 = arith.constant 3.200000e+01 : f32
    %10 = vector.broadcast %cst_3 : f32 to vector<16x1xf32>
    %11 = arith.divf %9, %10 : vector<16x1xf32>
    %cst_4 = arith.constant 9.99999974E-6 : f32
    %12 = vector.broadcast %cst_4 : f32 to vector<16x1xf32>
    %13 = arith.addf %11, %12 : vector<16x1xf32>
    %14 = math.rsqrt %13 : vector<16x1xf32>
    %15 = vector.broadcast %14 : vector<16x1xf32> to vector<16x32xf32>
    %16 = arith.mulf %6, %15 : vector<16x32xf32>
    %17 = arith.truncf %16 : vector<16x32xf32> to vector<16x32xbf16>
    %c0_5 = arith.constant 0 : index
    %c0_6 = arith.constant 0 : index
    %18 = vector.load %arg2[%c0_5, %c0_6] : memref<32x64xbf16, #tpu.memory_space<vmem>>, vector<32x64xbf16>
    %cst_7 = arith.constant dense<0.000000e+00> : vector<16x64xf32>
    %19 = tpu.matmul %17, %18, %cst_7 {dimension_numbers = #tpu.dot_dimension_numbers<[1], [0], [0], [1], [0, 0, 1, 1], [], []>} : vector<16x32xbf16>, vector<32x64xbf16>, vector<16x64xf32> -> vector<16x64xf32>
    %c0_8 = arith.constant 0 : index
    %c0_9 = arith.constant 0 : index
    %20 = vector.load %arg3[%c0_8, %c0_9] : memref<1x64xf32, #tpu.memory_space<vmem>>, vector<1x64xf32>
    %21 = vector.broadcast %20 : vector<1x64xf32> to vector<16x64xf32>
    %22 = arith.addf %19, %21 : vector<16x64xf32>
    %cst_10 = arith.constant 5.000000e-01 : f32
    %23 = vector.broadcast %cst_10 : f32 to vector<16x64xf32>
    %24 = arith.mulf %23, %22 : vector<16x64xf32>
    %cst_11 = arith.constant 0.707106769 : f32
    %25 = vector.broadcast %cst_11 : f32 to vector<16x64xf32>
    %26 = arith.mulf %22, %25 : vector<16x64xf32>
    %27 = math.erf %26 : vector<16x64xf32>
    %cst_12 = arith.constant 1.000000e+00 : f32
    %28 = vector.broadcast %cst_12 : f32 to vector<16x64xf32>
    %29 = arith.addf %28, %27 : vector<16x64xf32>
    %30 = arith.mulf %24, %29 : vector<16x64xf32>
    %31 = arith.truncf %30 : vector<16x64xf32> to vector<16x64xbf16>
    %c0_13 = arith.constant 0 : index
    %c0_14 = arith.constant 0 : index
    %32 = vector.load %arg4[%c0_13, %c0_14] : memref<64x32xbf16, #tpu.memory_space<vmem>>, vector<64x32xbf16>
    %cst_15 = arith.constant dense<0.000000e+00> : vector<16x32xf32>
    %33 = tpu.matmul %31, %32, %cst_15 {dimension_numbers = #tpu.dot_dimension_numbers<[1], [0], [0], [1], [0, 0, 1, 1], [], []>} : vector<16x64xbf16>, vector<64x32xbf16>, vector<16x32xf32> -> vector<16x32xf32>
    %c0_16 = arith.constant 0 : index
    %c0_17 = arith.constant 0 : index
    %34 = vector.load %arg5[%c0_16, %c0_17] : memref<1x32xf32, #tpu.memory_space<vmem>>, vector<1x32xf32>
    %35 = vector.broadcast %34 : vector<1x32xf32> to vector<16x32xf32>
    %36 = arith.addf %33, %35 : vector<16x32xf32>
    %c0_18 = arith.constant 0 : index
    %c0_19 = arith.constant 0 : index
    %37 = vector.load %arg6[%c0_18, %c0_19] : memref<16x32xf32, #tpu.memory_space<vmem>>, vector<16x32xf32>
    tpu.vector_store %arg6[%c0_18, %c0_19], %36 {strides = array<i32>} : memref<16x32xf32, #tpu.memory_space<vmem>>, vector<16x32xf32>,
    return
  }
  func.func @transform_0(%arg0: i32) -> (i32, i32) {
    %c0_i32 = arith.constant 0 : i32
    %c0_i32_0 = arith.constant 0 : i32
    return %arg0, %c0_i32 : i32, i32
  }
  func.func @transform_1(%arg0: i32) -> (i32, i32) {
    %c0_i32 = arith.constant 0 : i32
    %c0_i32_0 = arith.constant 0 : i32
    %c0_i32_1 = arith.constant 0 : i32
    return %c0_i32, %c0_i32_0 : i32, i32
  }
  func.func @transform_2(%arg0: i32) -> (i32, i32) {
    %c0_i32 = arith.constant 0 : i32
    %c0_i32_0 = arith.constant 0 : i32
    %c0_i32_1 = arith.constant 0 : i32
    return %c0_i32, %c0_i32_0 : i32, i32
  }
  func.func @transform_3(%arg0: i32) -> (i32, i32) {
    %c0_i32 = arith.constant 0 : i32
    %c0_i32_0 = arith.constant 0 : i32
    %c0_i32_1 = arith.constant 0 : i32
    return %c0_i32, %c0_i32_0 : i32, i32
  }
  func.func @transform_4(%arg0: i32) -> (i32, i32) {
    %c0_i32 = arith.constant 0 : i32
    %c0_i32_0 = arith.constant 0 : i32
    %c0_i32_1 = arith.constant 0 : i32
    return %c0_i32, %c0_i32_0 : i32, i32
  }
  func.func @transform_5(%arg0: i32) -> (i32, i32) {
    %c0_i32 = arith.constant 0 : i32
    %c0_i32_0 = arith.constant 0 : i32
    return %arg0, %c0_i32 : i32, i32
  }
}

</mosaic_0001>

<bundles_post_ra>
// kernel: _ff_impl.1
= control target key start
LH: loop header
LB: loop body
LE: loop exit
PB: predicated region body
PF: predicated region fallthrough
CT: control target
= control target key end

     0   :  { %10 = vsyncpa [#allocation3], 0  ;;  %s631_s0 = inlined_call_operand.hbm [shape: f32[16,32], index: 0, kind: input, shape index: {}]   ;;  %s632_s1 = inlined_call_operand.hbm [shape: bf16[32,64], index: 1, kind: input, shape index: {}]   ;;  %s633_s2 = inlined_call_operand.hbm [shape: f32[1,64], index: 2, kind: input, shape index: {}]   ;;  %s634_s3 = inlined_call_operand.hbm [shape: bf16[64,32], index: 3, kind: input, shape index: {}]   ;;  %s635_s4 = inlined_call_operand.hbm [shape: f32[1,32], index: 4, kind: input, shape index: {}]   ;;  %s636_s5 = inlined_call_operand.hbm [shape: f32[16,32], index: 5, kind: output, shape index: {}]  }
   0x1   :  { %11 = vsyncpa [#allocation6], 0 }
   0x2   :  { %12 = vsyncpa [#allocation9], 0 }
   0x3   :  { %13 = vsyncpa [#allocation4], 0  ;;  %s504_s18 = smov [#allocation5]   ;;  %s364_s22 = scalar_lea.hbm %s632_s1, 256 }
   0x4   :  { %s31_s19 = sshll.u32 %s504_s18, 4  ;;  %p365_p0 = scmp.ne.s32.totalorder %s632_s1, %s364_s22  ;;  %s32_s19 = int_to_ptr.vmem [resolvable:$true] %s31_s19 }
   0x5   :  { %p368_p1 = scmp.lt.u32.totalorder %s364_s22, %s632_s1 }
   0x7   :  { %p370_p2 = pnand %p368_p1, %p365_p0 }
   0x9   :  { %373 = shalt.err (!%p370_p2)
}
   0xa   :  { %s374_s27 = scalar_lea.vmem %s32_s19, 256  ;;  %p379_p4 = scmp.lt.s32.totalorder %s32_s19, %s32_s19 }
   0xb   :  { %p375_p3 = scmp.ne.s32.totalorder %s32_s19, %s374_s27  ;;  %p380_p5 = scmp.lt.s32.totalorder %s374_s27, %s374_s27 }
   0xd   :  { %p381_p6 = por %p380_p5, %p379_p4 }
   0xf   :  { %p382_p7 = pnand %p381_p6, %p375_p3 }
  0x11   :  { %385 = shalt.err (!%p382_p7)
}
  0x12   :  { %s505_s28 = smov 64   ;;  %s506_s29 = smov 4  }
  0x13   :  { %37 = dma.hbm_to_vmem [thread:$0]  %s632_s1, 256, %s32_s19, [#allocation6], %s505_s28, %s505_s28, %s506_s29  }
  0x14   :  { %s507_s7 = smov [#allocation8]   ;;  %s508_s9 = smov [#allocation2]  }
  0x15   :  { %s53_s8 = sshll.u32 %s507_s7, 4  ;;  %s19_s10 = sshll.u32 %s508_s9, 4  ;;  %s54_s8 = int_to_ptr.vmem [resolvable:$true] %s53_s8  ;;  %s20_s10 = int_to_ptr.vmem [resolvable:$true] %s19_s10 }
  0x16   :  { %s386_s13 = scalar_lea.hbm %s634_s3, 512 }
  0x17   :  { %p387_p8 = scmp.ne.s32.totalorder %s634_s3, %s386_s13  ;;  %p390_p9 = scmp.lt.u32.totalorder %s386_s13, %s634_s3 }
  0x19   :  { %p392_p10 = pnand %p390_p9, %p387_p8 }
  0x1b   :  { %395 = shalt.err (!%p392_p10)
}
  0x1c   :  { %s396_s1 = scalar_lea.vmem %s54_s8, 512  ;;  %p401_p12 = scmp.lt.s32.totalorder %s54_s8, %s54_s8 }
  0x1d   :  { %p397_p11 = scmp.ne.s32.totalorder %s54_s8, %s396_s1  ;;  %p402_p13 = scmp.lt.s32.totalorder %s396_s1, %s396_s1 }
  0x1f   :  { %p403_p0 = por %p402_p13, %p401_p12 }
  0x21   :  { %p404_p1 = pnand %p403_p0, %p397_p11 }
  0x23   :  { %407 = shalt.err (!%p404_p1)
}
  0x24   :  { %59 = dma.hbm_to_vmem [thread:$0]  %s634_s3, 512, %s54_s8, [#allocation9], %s505_s28, %s505_s28, %s506_s29  }
  0x25   :  { %s408_s22 = scalar_lea.hbm %s631_s0, 256 }
  0x26   :  { %p409_p2 = scmp.ne.s32.totalorder %s631_s0, %s408_s22  ;;  %p412_p3 = scmp.lt.u32.totalorder %s408_s22, %s631_s0 }
  0x28   :  { %p414_p4 = pnand %p412_p3, %p409_p2 }
  0x2a   :  { %417 = shalt.err (!%p414_p4)
}
  0x2b   :  { %s418_s27 = scalar_lea.vmem %s20_s10, 256  ;;  %p423_p6 = scmp.lt.s32.totalorder %s20_s10, %s20_s10 }
  0x2c   :  { %p419_p5 = scmp.ne.s32.totalorder %s20_s10, %s418_s27  ;;  %p424_p7 = scmp.lt.s32.totalorder %s418_s27, %s418_s27 }
  0x2e   :  { %p425_p8 = por %p424_p7, %p423_p6 }
  0x30   :  { %p426_p9 = pnand %p425_p8, %p419_p5 }
  0x32   :  { %429 = shalt.err (!%p426_p9)
}
  0x33   :  { %s509_s3 = smov 128   ;;  %s510_s28 = smov 8  }
  0x34   :  { %25 = dma.hbm_to_vmem [thread:$0]  %s631_s0, 256, %s20_s10, [#allocation3], %s509_s3, %s509_s3, %s510_s28  }
  0x35   :  { %s511_s6 = smov [#allocation7]   ;;  %s512_s8 = smov [#allocation10]  }
  0x36   :  { %s44_s7 = sshll.u32 %s511_s6, 4  ;;  %s66_s9 = sshll.u32 %s512_s8, 4  ;;  %s45_s7 = int_to_ptr.vmem [resolvable:$true] %s44_s7  ;;  %s67_s9 = int_to_ptr.vmem [resolvable:$true] %s66_s9 }
  0x37   :  { %s430_s13 = scalar_lea.hbm %s633_s2, 16 }
  0x38   :  { %p431_p10 = scmp.ne.s32.totalorder %s633_s2, %s430_s13  ;;  %p434_p11 = scmp.lt.u32.totalorder %s430_s13, %s633_s2 }
  0x3a   :  { %p436_p12 = pnand %p434_p11, %p431_p10 }
  0x3c   :  { %439 = shalt.err (!%p436_p12)
}
  0x3d   :  { %s440_s0 = scalar_lea.vmem %s45_s7, 16  ;;  %s444_s10 = scalar_lea.vmem %s45_s7, 32 }
  0x3e   :  { %p441_p13 = scmp.ne.s32.totalorder %s45_s7, %s440_s0  ;;  %p445_p0 = scmp.lt.s32.totalorder %s45_s7, %s45_s7 }
  0x3f   :  { %p446_p1 = scmp.lt.s32.totalorder %s444_s10, %s440_s0 }
  0x41   :  { %p447_p2 = por %p446_p1, %p445_p0 }
  0x43   :  { %p448_p3 = pnand %p447_p2, %p441_p13 }
  0x45   :  { %451 = shalt.err (!%p448_p3)
}
  0x46   :  { %47 = dma.hbm_to_vmem [thread:$0]  %s633_s2, 16, %s45_s7, [#allocation6]  }
  0x47   :  { %s452_s21 = scalar_lea.hbm %s635_s4, 16 }
  0x48   :  { %p453_p4 = scmp.ne.s32.totalorder %s635_s4, %s452_s21  ;;  %p456_p5 = scmp.lt.u32.totalorder %s452_s21, %s635_s4 }
  0x4a   :  { %p458_p6 = pnand %p456_p5, %p453_p4 }
  0x4c   :  { %461 = shalt.err (!%p458_p6)
}
  0x4d   :  { %s462_s26 = scalar_lea.vmem %s67_s9, 16  ;;  %s466_s27 = scalar_lea.vmem %s67_s9, 32 }
  0x4e   :  { %p463_p7 = scmp.ne.s32.totalorder %s67_s9, %s462_s26  ;;  %p467_p8 = scmp.lt.s32.totalorder %s67_s9, %s67_s9 }
  0x4f   :  { %p468_p9 = scmp.lt.s32.totalorder %s466_s27, %s462_s26 }
  0x51   :  { %p469_p10 = por %p468_p9, %p467_p8 }
  0x53   :  { %p470_p11 = pnand %p469_p10, %p463_p7 }
  0x55   :  { %473 = shalt.err (!%p470_p11)
}
  0x56   :  { %69 = dma.hbm_to_vmem [thread:$0]  %s635_s4, 16, %s67_s9, [#allocation9]  }
  0x57   :  { %496 = dma.done.wait [#allocation3], 256  }
  0x58   :  { %497 = vsyncadd [#allocation3], 4294967040 }
  0x59   :  { %498 = dma.done.wait [#allocation6], 272  }
  0x5a   :  { %499 = vsyncadd [#allocation6], 4294967024 }
  0x5b   :  { %500 = dma.done.wait [#allocation9], 528  }
  0x5c   :  { %501 = vsyncadd [#allocation9], 4294966768  ;;  %vm88_vm0 = vcmask 261120   ;;  %v86_v0 = vld [vmem:[#allocation2] sm:$0xff]  ;;  %v87_v1 = vld [vmem:[#allocation2 + $0x8] sm:$0xff]  ;;  %v513_v15 = vmov 0.0  }
  0x5d   :  { %v89_v2 = vsel %vm88_vm0, %v86_v0, 0.0  ;;  %v92_v3 = vsel %vm88_vm0, %v87_v1, 0.0  ;;  %v350_v14 = vld [vmem:[#allocation5] sm:$0xff]   ;;  %318 = vmatprep.subr.bf16.mxu0 %v513_v15  ;;  %vm514_vm1 = vmmov 0   ;;  %v351_v16 = vld [vmem:[#allocation5 + $0x8] sm:$0xff]   ;;  %326 = vmatprep.subr.bf16.mxu1 %v513_v15  ;;  %v352_v28 = vld [vmem:[#allocation8] sm:$0xff]  }
  0x5e   :  { %90 = vadd.xlane.f32.xlu0 %v89_v2  ;;  %322 = vmatprep.mubr.msk.bf16.mxu0 %vm514_vm1, %v513_v15  ;;  %v353_v29 = vld [vmem:[#allocation8 + $0x8] sm:$0xff]   ;;  %v354_v30 = vld [vmem:[#allocation8 + $0x10] sm:$0xff]   ;;  %v355_v31 = vld [vmem:[#allocation8 + $0x18] sm:$0xff]   ;;  %vm234_vm2 = vcmask 523264   ;;  %s515_s4 = smov [#allocation11]  }
  0x5f   :  { %319 = vmatpush3.bf16.msra.mxu0 %v350_v14  ;;  %334 = vmatprep.mubr.msk.bf16.mxu1 %vm514_vm1, %v513_v15  ;;  %v300_v32 = vld [vmem:[#allocation7] ss:$0 sm:$0xff]  ;;  %v304_v50 = vld [vmem:[#allocation10] ss:$0 sm:$0xff]  ;;  %s286_s30 = sshll.u32 %s515_s4, 4  ;;  %s287_s30 = int_to_ptr.vmem [resolvable:$true] %s286_s30 }
  0x60   :  { %320 = vmatprep.subr.bf16.mxu0 %v513_v15  ;;  %327 = vmatpush3.bf16.msra.mxu1 %v352_v28  ;;  %s474_s6 = scalar_lea.vmem %s287_s30, 256  ;;  %p479_p13 = scmp.lt.s32.totalorder %s287_s30, %s287_s30 }
  0x61   :  { %328 = vmatprep.subr.bf16.mxu1 %v513_v15  ;;  %p475_p12 = scmp.ne.s32.totalorder %s287_s30, %s474_s6  ;;  %p480_p0 = scmp.lt.s32.totalorder %s474_s6, %s474_s6 }
  0x62   :  { %93 = vadd.xlane.f32.xlu0 %v92_v3 }
  0x63   :  { %321 = vmatpush3.bf16.msra.mxu0 %v351_v16  ;;  %p481_p1 = por %p480_p0, %p479_p13 }
  0x64   :  { %329 = vmatpush3.bf16.msra.mxu1 %v353_v29 }
  0x65   :  { %330 = vmatprep.subr.bf16.mxu1 %v513_v15  ;;  %p482_p2 = pnand %p481_p1, %p475_p12 }
  0x68   :  { %331 = vmatpush3.bf16.msra.mxu1 %v354_v30 }
  0x69   :  { %332 = vmatprep.subr.bf16.mxu1 %v513_v15 }
  0x6c   :  { %333 = vmatpush3.bf16.msra.mxu1 %v355_v31 }
  0xeb   :  { %v91_v4 = vpop.xlane.xlu0 %90 }
  0xec   :  { %v96_v5 = vmul.f32 0.03125, %v91_v4 }
  0xee   :  { %v98_v6 = vsub.f32 %v86_v0, %v96_v5 }
  0xef   :  { %v94_v7 = vpop.xlane.xlu0 %93 }
  0xf0   :  { %v97_v8 = vmul.f32 0.03125, %v94_v7  ;;  %v100_v9 = vmul.f32 %v98_v6, %v98_v6 }
  0xf2   :  { %v99_v10 = vsub.f32 %v87_v1, %v97_v8  ;;  %v102_v11 = vsel %vm88_vm0, %v100_v9, 0.0 }
  0xf3   :  { %103 = vadd.xlane.f32.xlu1 %v102_v11 }
  0xf4   :  { %v101_v12 = vmul.f32 %v99_v10, %v99_v10 }
  0xf6   :  { %v105_v13 = vsel %vm88_vm0, %v101_v12, 0.0 }
  0xf7   :  { %106 = vadd.xlane.f32.xlu1 %v105_v13 }
 0x180   :  { %v104_v17 = vpop.xlane.xlu1 %103 }
 0x181   :  { %v108_v18 = vmul.f32 0.03125, %v104_v17 }
 0x183   :  { %v110_v19 = vadd.f32 1e-05, %v108_v18 }
 0x184   :  { %v107_v20 = vpop.xlane.xlu1 %106 }
 0x185   :  { %v109_v21 = vmul.f32 0.03125, %v107_v20  ;;  %356 = vrsqrt.f32 %v110_v19 }
 0x187   :  { %v111_v22 = vadd.f32 1e-05, %v109_v21 }
 0x189   :  { %358 = vrsqrt.f32 %v111_v22 }
 0x18f   :  { %v357_v23 = vpop.eup %356 }
 0x190   :  { %v114_v25 = vmul.f32 %v357_v23, %v98_v6 }
 0x193   :  { %v359_v24 = vpop.eup %358 }
 0x194   :  { %v115_v26 = vmul.f32 %v359_v24, %v99_v10 }
 0x196   :  { %v116_v27 = vpack.c.bf16 %v115_v26, %v114_v25 }
 0x198   :  { %323 = vmatmul.mubr.msk.bf16.vlgmr.msra.gmra.mrb[0].mxu0 %vm88_vm0, %v116_v27 }
 0x26b   :  { %v177_v33 = vpop.f32.mrb[0].mxu0 }
 0x26c   :  { %v178_v34 = vadd.f32 %v300_v32, %v177_v33  ;;  %v324_v35 = vpop.f32.mrb[1].mxu0 }
 0x26d   :  { %v180_v36 = vpop.f32.mrb[2].mxu0 }
 0x26e   :  { %v186_v37 = vmul.f32 0.70710677, %v178_v34  ;;  %v181_v38 = vadd.f32 %v300_v32, %v180_v36  ;;  %v325_v39 = vpop.f32.mrb[3].mxu0  ;;  %v184_v44 = vmul.f32 0.5, %v178_v34 }
 0x270   :  { %360 = verf.f32 %v186_v37  ;;  %v187_v40 = vmul.f32 0.70710677, %v181_v38  ;;  %v185_v45 = vmul.f32 0.5, %v181_v38 }
 0x272   :  { %362 = verf.f32 %v187_v40 }
 0x27a   :  { %v361_v41 = vpop.eup %360 }
 0x27b   :  { %v190_v42 = vadd.f32 1.0, %v361_v41 }
 0x27c   :  { %v363_v43 = vpop.eup %362 }
 0x27d   :  { %v191_v46 = vadd.f32 1.0, %v363_v43  ;;  %v192_v47 = vmul.f32 %v190_v42, %v184_v44 }
 0x27f   :  { %v193_v48 = vmul.f32 %v191_v46, %v185_v45 }
 0x281   :  { %v194_v49 = vpack.c.bf16 %v193_v48, %v192_v47 }
 0x283   :  { %335 = vmatmul.mubr.msk.bf16.vlgmr.msra.gmra.mrb[0].mxu1 %vm234_vm2, %v194_v49 }
 0x356   :  { %v272_v51 = vpop.f32.mrb[0].mxu1 }
 0x357   :  { %v273_v52 = vadd.f32 %v304_v50, %v272_v51  ;;  %v336_v53 = vpop.f32.mrb[1].mxu1 }
 0x358   :  { %v275_v54 = vpop.f32.mrb[2].mxu1 }
 0x359   :  { %279 = vst.msk [vmem:[#allocation11] sm:$0xff] %vm88_vm0, %v273_v52  ;;  %v276_v55 = vadd.f32 %v304_v50, %v275_v54  ;;  %v337_v56 = vpop.f32.mrb[3].mxu1 }
 0x35b   :  { %280 = vst.msk [vmem:[#allocation11 + $0x8] sm:$0xff] %vm88_vm0, %v276_v55 }
 0x35c   :  { %485 = shalt.err (!%p482_p2)
}
 0x35d   :  { %s486_s9 = scalar_lea.hbm %s636_s5, 256 }
 0x35e   :  { %p487_p3 = scmp.ne.s32.totalorder %s636_s5, %s486_s9  ;;  %p490_p4 = scmp.lt.u32.totalorder %s486_s9, %s636_s5 }
 0x360   :  { %p492_p5 = pnand %p490_p4, %p487_p3 }
 0x362   :  { %495 = shalt.err (!%p492_p5)
}
 0x363   :  { %292 = dma.vmem_to_hbm [thread:$0]  %s287_s30, 256, %s636_s5, [#allocation4], %s509_s3, %s509_s3, %s510_s28  }
 0x364   :  { %502 = dma.done.wait [#allocation4], 256  }
 0x365   :  { %503 = vsyncadd [#allocation4], 4294967040 }
 0x366   :  { %296 = vsyncpa [#allocation3], 1 }
 0x367   :  { %297 = vsyncpa [#allocation6], 1 }
 0x368   :  { %298 = vsyncpa [#allocation9], 1 }
 0x369   :  { %299 = vsyncpa [#allocation4], 1 }

// kernel: _ff_impl.1
= control target key start
LH: loop header
LB: loop body
LE: loop exit
PB: predicated region body
PF: predicated region fallthrough
CT: control target
= control target key end

     0   :  { %10 = vsyncpa [#allocation3], 0  ;;  %s631_s0 = inlined_call_operand.hbm [shape: f32[16,32], index: 0, kind: input, shape index: {}]   ;;  %s632_s1 = inlined_call_operand.hbm [shape: bf16[32,64], index: 1, kind: input, shape index: {}]   ;;  %s633_s2 = inlined_call_operand.hbm [shape: f32[1,64], index: 2, kind: input, shape index: {}]   ;;  %s634_s3 = inlined_call_operand.hbm [shape: bf16[64,32], index: 3, kind: input, shape index: {}]   ;;  %s635_s4 = inlined_call_operand.hbm [shape: f32[1,32], index: 4, kind: input, shape index: {}]   ;;  %s636_s5 = inlined_call_operand.hbm [shape: f32[16,32], index: 5, kind: output, shape index: {}]  }
   0x1   :  { %11 = vsyncpa [#allocation6], 0 }
   0x2   :  { %12 = vsyncpa [#allocation9], 0 }
   0x3   :  { %13 = vsyncpa [#allocation4], 0  ;;  %s504_s18 = smov [#allocation5]   ;;  %s364_s22 = scalar_lea.hbm %s632_s1, 256 }
   0x4   :  { %s31_s19 = sshll.u32 %s504_s18, 4  ;;  %p365_p0 = scmp.ne.s32.totalorder %s632_s1, %s364_s22  ;;  %s32_s19 = int_to_ptr.vmem [resolvable:$true] %s31_s19 }
   0x5   :  { %p368_p1 = scmp.lt.u32.totalorder %s364_s22, %s632_s1 }
   0x7   :  { %p370_p2 = pnand %p368_p1, %p365_p0 }
   0x9   :  { %373 = shalt.err (!%p370_p2)
}
   0xa   :  { %s374_s27 = scalar_lea.vmem %s32_s19, 256  ;;  %p379_p4 = scmp.lt.s32.totalorder %s32_s19, %s32_s19 }
   0xb   :  { %p375_p3 = scmp.ne.s32.totalorder %s32_s19, %s374_s27  ;;  %p380_p5 = scmp.lt.s32.totalorder %s374_s27, %s374_s27 }
   0xd   :  { %p381_p6 = por %p380_p5, %p379_p4 }
   0xf   :  { %p382_p7 = pnand %p381_p6, %p375_p3 }
  0x11   :  { %385 = shalt.err (!%p382_p7)
}
  0x12   :  { %s505_s28 = smov 64   ;;  %s506_s29 = smov 4  }
  0x13   :  { %37 = dma.hbm_to_vmem [thread:$0]  %s632_s1, 256, %s32_s19, [#allocation6], %s505_s28, %s505_s28, %s506_s29  }
  0x14   :  { %s507_s7 = smov [#allocation8]   ;;  %s508_s9 = smov [#allocation2]  }
  0x15   :  { %s53_s8 = sshll.u32 %s507_s7, 4  ;;  %s19_s10 = sshll.u32 %s508_s9, 4  ;;  %s54_s8 = int_to_ptr.vmem [resolvable:$true] %s53_s8  ;;  %s20_s10 = int_to_ptr.vmem [resolvable:$true] %s19_s10 }
  0x16   :  { %s386_s13 = scalar_lea.hbm %s634_s3, 512 }
  0x17   :  { %p387_p8 = scmp.ne.s32.totalorder %s634_s3, %s386_s13  ;;  %p390_p9 = scmp.lt.u32.totalorder %s386_s13, %s634_s3 }
  0x19   :  { %p392_p10 = pnand %p390_p9, %p387_p8 }
  0x1b   :  { %395 = shalt.err (!%p392_p10)
}
  0x1c   :  { %s396_s1 = scalar_lea.vmem %s54_s8, 512  ;;  %p401_p12 = scmp.lt.s32.totalorder %s54_s8, %s54_s8 }
  0x1d   :  { %p397_p11 = scmp.ne.s32.totalorder %s54_s8, %s396_s1  ;;  %p402_p13 = scmp.lt.s32.totalorder %s396_s1, %s396_s1 }
  0x1f   :  { %p403_p0 = por %p402_p13, %p401_p12 }
  0x21   :  { %p404_p1 = pnand %p403_p0, %p397_p11 }
  0x23   :  { %407 = shalt.err (!%p404_p1)
}
  0x24   :  { %59 = dma.hbm_to_vmem [thread:$0]  %s634_s3, 512, %s54_s8, [#allocation9], %s505_s28, %s505_s28, %s506_s29  }
  0x25   :  { %s408_s22 = scalar_lea.hbm %s631_s0, 256 }
  0x26   :  { %p409_p2 = scmp.ne.s32.totalorder %s631_s0, %s408_s22  ;;  %p412_p3 = scmp.lt.u32.totalorder %s408_s22, %s631_s0 }
  0x28   :  { %p414_p4 = pnand %p412_p3, %p409_p2 }
  0x2a   :  { %417 = shalt.err (!%p414_p4)
}
  0x2b   :  { %s418_s27 = scalar_lea.vmem %s20_s10, 256  ;;  %p423_p6 = scmp.lt.s32.totalorder %s20_s10, %s20_s10 }
  0x2c   :  { %p419_p5 = scmp.ne.s32.totalorder %s20_s10, %s418_s27  ;;  %p424_p7 = scmp.lt.s32.totalorder %s418_s27, %s418_s27 }
  0x2e   :  { %p425_p8 = por %p424_p7, %p423_p6 }
  0x30   :  { %p426_p9 = pnand %p425_p8, %p419_p5 }
  0x32   :  { %429 = shalt.err (!%p426_p9)
}
  0x33   :  { %s509_s3 = smov 128   ;;  %s510_s28 = smov 8  }
  0x34   :  { %25 = dma.hbm_to_vmem [thread:$0]  %s631_s0, 256, %s20_s10, [#allocation3], %s509_s3, %s509_s3, %s510_s28  }
  0x35   :  { %s511_s6 = smov [#allocation7]   ;;  %s512_s8 = smov [#allocation10]  }
  0x36   :  { %s44_s7 = sshll.u32 %s511_s6, 4  ;;  %s66_s9 = sshll.u32 %s512_s8, 4  ;;  %s45_s7 = int_to_ptr.vmem [resolvable:$true] %s44_s7  ;;  %s67_s9 = int_to_ptr.vmem [resolvable:$true] %s66_s9 }
  0x37   :  { %s430_s13 = scalar_lea.hbm %s633_s2, 16 }
  0x38   :  { %p431_p10 = scmp.ne.s32.totalorder %s633_s2, %s430_s13  ;;  %p434_p11 = scmp.lt.u32.totalorder %s430_s13, %s633_s2 }
  0x3a   :  { %p436_p12 = pnand %p434_p11, %p431_p10 }
  0x3c   :  { %439 = shalt.err (!%p436_p12)
}
  0x3d   :  { %s440_s0 = scalar_lea.vmem %s45_s7, 16  ;;  %s444_s10 = scalar_lea.vmem %s45_s7, 32 }
  0x3e   :  { %p441_p13 = scmp.ne.s32.totalorder %s45_s7, %s440_s0  ;;  %p445_p0 = scmp.lt.s32.totalorder %s45_s7, %s45_s7 }
  0x3f   :  { %p446_p1 = scmp.lt.s32.totalorder %s444_s10, %s440_s0 }
  0x41   :  { %p447_p2 = por %p446_p1, %p445_p0 }
  0x43   :  { %p448_p3 = pnand %p447_p2, %p441_p13 }
  0x45   :  { %451 = shalt.err (!%p448_p3)
}
  0x46   :  { %47 = dma.hbm_to_vmem [thread:$0]  %s633_s2, 16, %s45_s7, [#allocation6]  }
  0x47   :  { %s452_s21 = scalar_lea.hbm %s635_s4, 16 }
  0x48   :  { %p453_p4 = scmp.ne.s32.totalorder %s635_s4, %s452_s21  ;;  %p456_p5 = scmp.lt.u32.totalorder %s452_s21, %s635_s4 }
  0x4a   :  { %p458_p6 = pnand %p456_p5, %p453_p4 }
  0x4c   :  { %461 = shalt.err (!%p458_p6)
}
  0x4d   :  { %s462_s26 = scalar_lea.vmem %s67_s9, 16  ;;  %s466_s27 = scalar_lea.vmem %s67_s9, 32 }
  0x4e   :  { %p463_p7 = scmp.ne.s32.totalorder %s67_s9, %s462_s26  ;;  %p467_p8 = scmp.lt.s32.totalorder %s67_s9, %s67_s9 }
  0x4f   :  { %p468_p9 = scmp.lt.s32.totalorder %s466_s27, %s462_s26 }
  0x51   :  { %p469_p10 = por %p468_p9, %p467_p8 }
  0x53   :  { %p470_p11 = pnand %p469_p10, %p463_p7 }
  0x55   :  { %473 = shalt.err (!%p470_p11)
}
  0x56   :  { %69 = dma.hbm_to_vmem [thread:$0]  %s635_s4, 16, %s67_s9, [#allocation9]  }
  0x57   :  { %496 = dma.done.wait [#allocation3], 256  }
  0x58   :  { %497 = vsyncadd [#allocation3], 4294967040 }
  0x59   :  { %498 = dma.done.wait [#allocation6], 272  }
  0x5a   :  { %499 = vsyncadd [#allocation6], 4294967024 }
  0x5b   :  { %500 = dma.done.wait [#allocation9], 528  }
  0x5c   :  { %501 = vsyncadd [#allocation9], 4294966768  ;;  %vm88_vm0 = vcmask 261120   ;;  %v86_v0 = vld [vmem:[#allocation2] sm:$0xff]  ;;  %v87_v1 = vld [vmem:[#allocation2 + $0x8] sm:$0xff]  ;;  %v513_v15 = vmov 0.0  }
  0x5d   :  { %v89_v2 = vsel %vm88_vm0, %v86_v0, 0.0  ;;  %v92_v3 = vsel %vm88_vm0, %v87_v1, 0.0  ;;  %v350_v14 = vld [vmem:[#allocation5] sm:$0xff]   ;;  %318 = vmatprep.subr.bf16.mxu0 %v513_v15  ;;  %vm514_vm1 = vmmov 0   ;;  %v351_v16 = vld [vmem:[#allocation5 + $0x8] sm:$0xff]   ;;  %326 = vmatprep.subr.bf16.mxu1 %v513_v15  ;;  %v352_v28 = vld [vmem:[#allocation8] sm:$0xff]  }
  0x5e   :  { %90 = vadd.xlane.f32.xlu0 %v89_v2  ;;  %322 = vmatprep.mubr.msk.bf16.mxu0 %vm514_vm1, %v513_v15  ;;  %v353_v29 = vld [vmem:[#allocation8 + $0x8] sm:$0xff]   ;;  %v354_v30 = vld [vmem:[#allocation8 + $0x10] sm:$0xff]   ;;  %v355_v31 = vld [vmem:[#allocation8 + $0x18] sm:$0xff]   ;;  %vm234_vm2 = vcmask 523264   ;;  %s515_s4 = smov [#allocation11]  }
  0x5f   :  { %319 = vmatpush3.bf16.msra.mxu0 %v350_v14  ;;  %334 = vmatprep.mubr.msk.bf16.mxu1 %vm514_vm1, %v513_v15  ;;  %v300_v32 = vld [vmem:[#allocation7] ss:$0 sm:$0xff]  ;;  %v304_v50 = vld [vmem:[#allocation10] ss:$0 sm:$0xff]  ;;  %s286_s30 = sshll.u32 %s515_s4, 4  ;;  %s287_s30 = int_to_ptr.vmem [resolvable:$true] %s286_s30 }
  0x60   :  { %320 = vmatprep.subr.bf16.mxu0 %v513_v15  ;;  %327 = vmatpush3.bf16.msra.mxu1 %v352_v28  ;;  %s474_s6 = scalar_lea.vmem %s287_s30, 256  ;;  %p479_p13 = scmp.lt.s32.totalorder %s287_s30, %s287_s30 }
  0x61   :  { %328 = vmatprep.subr.bf16.mxu1 %v513_v15  ;;  %p475_p12 = scmp.ne.s32.totalorder %s287_s30, %s474_s6  ;;  %p480_p0 = scmp.lt.s32.totalorder %s474_s6, %s474_s6 }
  0x62   :  { %93 = vadd.xlane.f32.xlu0 %v92_v3 }
  0x63   :  { %321 = vmatpush3.bf16.msra.mxu0 %v351_v16  ;;  %p481_p1 = por %p480_p0, %p479_p13 }
  0x64   :  { %329 = vmatpush3.bf16.msra.mxu1 %v353_v29 }
  0x65   :  { %330 = vmatprep.subr.bf16.mxu1 %v513_v15  ;;  %p482_p2 = pnand %p481_p1, %p475_p12 }
  0x68   :  { %331 = vmatpush3.bf16.msra.mxu1 %v354_v30 }
  0x69   :  { %332 = vmatprep.subr.bf16.mxu1 %v513_v15 }
  0x6c   :  { %333 = vmatpush3.bf16.msra.mxu1 %v355_v31 }
  0xeb   :  { %v91_v4 = vpop.xlane.xlu0 %90 }
  0xec   :  { %v96_v5 = vmul.f32 0.03125, %v91_v4 }
  0xee   :  { %v98_v6 = vsub.f32 %v86_v0, %v96_v5 }
  0xef   :  { %v94_v7 = vpop.xlane.xlu0 %93 }
  0xf0   :  { %v97_v8 = vmul.f32 0.03125, %v94_v7  ;;  %v100_v9 = vmul.f32 %v98_v6, %v98_v6 }
  0xf2   :  { %v99_v10 = vsub.f32 %v87_v1, %v97_v8  ;;  %v102_v11 = vsel %vm88_vm0, %v100_v9, 0.0 }
  0xf3   :  { %103 = vadd.xlane.f32.xlu1 %v102_v11 }
  0xf4   :  { %v101_v12 = vmul.f32 %v99_v10, %v99_v10 }
  0xf6   :  { %v105_v13 = vsel %vm88_vm0, %v101_v12, 0.0 }
  0xf7   :  { %106 = vadd.xlane.f32.xlu1 %v105_v13 }
 0x180   :  { %v104_v17 = vpop.xlane.xlu1 %103 }
 0x181   :  { %v108_v18 = vmul.f32 0.03125, %v104_v17 }
 0x183   :  { %v110_v19 = vadd.f32 1e-05, %v108_v18 }
 0x184   :  { %v107_v20 = vpop.xlane.xlu1 %106 }
 0x185   :  { %v109_v21 = vmul.f32 0.03125, %v107_v20  ;;  %356 = vrsqrt.f32 %v110_v19 }
 0x187   :  { %v111_v22 = vadd.f32 1e-05, %v109_v21 }
 0x189   :  { %358 = vrsqrt.f32 %v111_v22 }
 0x18f   :  { %v357_v23 = vpop.eup %356 }
 0x190   :  { %v114_v25 = vmul.f32 %v357_v23, %v98_v6 }
 0x193   :  { %v359_v24 = vpop.eup %358 }
 0x194   :  { %v115_v26 = vmul.f32 %v359_v24, %v99_v10 }
 0x196   :  { %v116_v27 = vpack.c.bf16 %v115_v26, %v114_v25 }
 0x198   :  { %323 = vmatmul.mubr.msk.bf16.vlgmr.msra.gmra.mrb[0].mxu0 %vm88_vm0, %v116_v27 }
 0x26b   :  { %v177_v33 = vpop.f32.mrb[0].mxu0 }
 0x26c   :  { %v178_v34 = vadd.f32 %v300_v32, %v177_v33  ;;  %v324_v35 = vpop.f32.mrb[1].mxu0 }
 0x26d   :  { %v180_v36 = vpop.f32.mrb[2].mxu0 }
 0x26e   :  { %v186_v37 = vmul.f32 0.70710677, %v178_v34  ;;  %v181_v38 = vadd.f32 %v300_v32, %v180_v36  ;;  %v325_v39 = vpop.f32.mrb[3].mxu0  ;;  %v184_v44 = vmul.f32 0.5, %v178_v34 }
 0x270   :  { %360 = verf.f32 %v186_v37  ;;  %v187_v40 = vmul.f32 0.70710677, %v181_v38  ;;  %v185_v45 = vmul.f32 0.5, %v181_v38 }
 0x272   :  { %362 = verf.f32 %v187_v40 }
 0x27a   :  { %v361_v41 = vpop.eup %360 }
 0x27b   :  { %v190_v42 = vadd.f32 1.0, %v361_v41 }
 0x27c   :  { %v363_v43 = vpop.eup %362 }
 0x27d   :  { %v191_v46 = vadd.f32 1.0, %v363_v43  ;;  %v192_v47 = vmul.f32 %v190_v42, %v184_v44 }
 0x27f   :  { %v193_v48 = vmul.f32 %v191_v46, %v185_v45 }
 0x281   :  { %v194_v49 = vpack.c.bf16 %v193_v48, %v192_v47 }
 0x283   :  { %335 = vmatmul.mubr.msk.bf16.vlgmr.msra.gmra.mrb[0].mxu1 %vm234_vm2, %v194_v49 }
 0x356   :  { %v272_v51 = vpop.f32.mrb[0].mxu1 }
 0x357   :  { %v273_v52 = vadd.f32 %v304_v50, %v272_v51  ;;  %v336_v53 = vpop.f32.mrb[1].mxu1 }
 0x358   :  { %v275_v54 = vpop.f32.mrb[2].mxu1 }
 0x359   :  { %279 = vst.msk [vmem:[#allocation11] sm:$0xff] %vm88_vm0, %v273_v52  ;;  %v276_v55 = vadd.f32 %v304_v50, %v275_v54  ;;  %v337_v56 = vpop.f32.mrb[3].mxu1 }
 0x35b   :  { %280 = vst.msk [vmem:[#allocation11 + $0x8] sm:$0xff] %vm88_vm0, %v276_v55 }
 0x35c   :  { %485 = shalt.err (!%p482_p2)
}
 0x35d   :  { %s486_s9 = scalar_lea.hbm %s636_s5, 256 }
 0x35e   :  { %p487_p3 = scmp.ne.s32.totalorder %s636_s5, %s486_s9  ;;  %p490_p4 = scmp.lt.u32.totalorder %s486_s9, %s636_s5 }
 0x360   :  { %p492_p5 = pnand %p490_p4, %p487_p3 }
 0x362   :  { %495 = shalt.err (!%p492_p5)
}
 0x363   :  { %292 = dma.vmem_to_hbm [thread:$0]  %s287_s30, 256, %s636_s5, [#allocation4], %s509_s3, %s509_s3, %s510_s28  }
 0x364   :  { %502 = dma.done.wait [#allocation4], 256  }
 0x365   :  { %503 = vsyncadd [#allocation4], 4294967040 }
 0x366   :  { %296 = vsyncpa [#allocation3], 1 }
 0x367   :  { %297 = vsyncpa [#allocation6], 1 }
 0x368   :  { %298 = vsyncpa [#allocation9], 1 }
 0x369   :  { %299 = vsyncpa [#allocation4], 1 }

</bundles_post_ra>
